<compile_context>
chip_gen: v6e
topology: v6e:2x2x1
jax: 0.10.0
libtpu: 0.0.40
codegen_flags: <defaults>
</compile_context>

<pallas_src>
import functools

import jax
import jax.numpy as jnp
from jax.experimental import pallas as pl
from jax.experimental.pallas import tpu as pltpu


# ----------------------------------------------------------------------------
# Kernel 1: per-batch 1x1-conv MLP on the frequency tensor.
#   inputs  : yr, yi            (1, C, TL)   real / imag channels-major
#   weights : w1r (2C,C), w1i (2C,C), b1 (2C,1)
#             w2r (C,2C), w2i (C,2C), b2r (C,1), b2i (C,1)
#   outputs : o_real, o_imag    (1, C, TL)
# ----------------------------------------------------------------------------
def _mlp_kernel(yr_ref, yi_ref, w1r_ref, w1i_ref, b1_ref,
                w2r_ref, w2i_ref, b2r_ref, b2i_ref,
                or_ref, oi_ref, *, compute_dtype):
    yr = yr_ref[0].astype(compute_dtype)            # (C, TL)
    yi = yi_ref[0].astype(compute_dtype)            # (C, TL)

    # h = W1 @ [yr; yi] + b1  ==  W1[:, :C]@yr + W1[:, C:]@yi + b1
    h = (jnp.dot(w1r_ref[...].astype(compute_dtype), yr,
                 preferred_element_type=jnp.float32)
         + jnp.dot(w1i_ref[...].astype(compute_dtype), yi,
                   preferred_element_type=jnp.float32)
         + b1_ref[...])                             # (2C, TL) f32
    h = jnp.maximum(h, 0.0)                         # ReLU in f32
    hc = h.astype(compute_dtype)

    # o = W2 @ h + b2, split into real/imag halves (rows of W2).
    o_real = (jnp.dot(w2r_ref[...].astype(compute_dtype), hc,
                      preferred_element_type=jnp.float32) + b2r_ref[...])
    o_imag = (jnp.dot(w2i_ref[...].astype(compute_dtype), hc,
                      preferred_element_type=jnp.float32) + b2i_ref[...])
    or_ref[0] = o_real.astype(or_ref.dtype)
    oi_ref[0] = o_imag.astype(oi_ref.dtype)


def _mlp_pallas(yr, yi, w1, b1, w2, b2, compute_dtype):
    """yr/yi: (B, C, L) f32. w*: (2C, 2C), b*: (2C,). Returns (o_real, o_imag)."""
    B, C, L = yr.shape
    C2 = 2 * C

    w1 = w1.astype(jnp.float32)
    w2 = w2.astype(jnp.float32)
    b1 = b1.astype(jnp.float32)
    b2 = b2.astype(jnp.float32)
    w1r, w1i = w1[:, :C], w1[:, C:]                 # (2C, C) each
    w2r, w2i = w2[:C, :], w2[C:, :]                 # (C, 2C) each
    b1c = b1.reshape(C2, 1)
    b2r = b2[:C].reshape(C, 1)
    b2i = b2[C:].reshape(C, 1)

    # Lane tile: full L when small, otherwise a multiple of 128 sized so the
    # (2C, TL) f32 slabs stay ~1 MiB each (safe on v7x's smaller VMEM).
    max_tl = max(128, min(4096, (1 << 20) // (4 * C2)))
    TL = L if L <= max_tl else (max_tl // 128) * 128
    grid = (B, pl.cdiv(L, TL))

    act_spec = pl.BlockSpec((1, C, TL), lambda b, l: (b, 0, l))
    w_c2xc = pl.BlockSpec((C2, C), lambda b, l: (0, 0))
    w_cxc2 = pl.BlockSpec((C, C2), lambda b, l: (0, 0))
    b_c2 = pl.BlockSpec((C2, 1), lambda b, l: (0, 0))
    b_c = pl.BlockSpec((C, 1), lambda b, l: (0, 0))

    kernel = functools.partial(_mlp_kernel, compute_dtype=compute_dtype)
    o_real, o_imag = pl.pallas_call(
        kernel,
        out_shape=(jax.ShapeDtypeStruct((B, C, L), jnp.float32),
                   jax.ShapeDtypeStruct((B, C, L), jnp.float32)),
        grid_spec=pltpu.PrefetchScalarGridSpec(
            num_scalar_prefetch=0,
            grid=grid,
            in_specs=[act_spec, act_spec,
                      w_c2xc, w_c2xc, b_c2,
                      w_cxc2, w_cxc2, b_c, b_c],
            out_specs=[act_spec, act_spec],
        ),
        compiler_params=pltpu.CompilerParams(
            dimension_semantics=("parallel", "parallel")),
    )(yr.astype(jnp.float32), yi.astype(jnp.float32),
      w1r, w1i, b1c, w2r, w2i, b2r, b2i)
    return o_real, o_imag


# ----------------------------------------------------------------------------
# Kernel 2: elementwise modulation  out = y * x  (lane-dense (B*C, H*W) layout)
# ----------------------------------------------------------------------------
def _mul_kernel(a_ref, b_ref, o_ref):
    o_ref[...] = a_ref[...] * b_ref[...]


def _modulate_pallas(y_sp, x):
    """y_sp, x: (B, C, H, W). Returns y_sp * x, same shape."""
    B, C, H, W = x.shape
    R, L = B * C, H * W
    a = y_sp.reshape(R, L)
    b = x.reshape(R, L)

    TR = R if R <= 256 else 256                     # multiple of 8 or full dim
    TL = L if L <= 8192 else 8192                   # multiple of 128 or full dim
    grid = (pl.cdiv(R, TR), pl.cdiv(L, TL))

    spec = pl.BlockSpec((TR, TL), lambda i, j: (i, j))
    out = pl.pallas_call(
        _mul_kernel,
        out_shape=jax.ShapeDtypeStruct((R, L), x.dtype),
        grid_spec=pltpu.PrefetchScalarGridSpec(
            num_scalar_prefetch=0,
            grid=grid,
            in_specs=[spec, spec],
            out_specs=spec,
        ),
        compiler_params=pltpu.CompilerParams(
            dimension_semantics=("parallel", "parallel")),
    )(a, b)
    return out.reshape(B, C, H, W)


# ----------------------------------------------------------------------------
# FFML forward
# ----------------------------------------------------------------------------
def ffml_forward(x, params, norm="backward", compute_dtype=jnp.float32):
    """x: (B, C, H, W) float32, NCHW (same as PyTorch)."""
    B, C, H, W = x.shape
    w1, b1, w2, b2 = params                          # w*: (2C, 2C), b*: (2C,)

    # rfft2 over last two dims (matches torch.fft.rfft2 default dims=(-2,-1)).
    y = jnp.fft.rfft2(x.astype(jnp.float32), norm=norm)   # (B, C, H, Wf) complex
    Wf = y.shape[-1]
    L = H * Wf
    yr = jnp.real(y).reshape(B, C, L)                # channels-major, no transpose
    yi = jnp.imag(y).reshape(B, C, L)

    o_real, o_imag = _mlp_pallas(yr, yi, w1, b1, w2, b2, compute_dtype)

    y_c = jax.lax.complex(o_real.reshape(B, C, H, Wf),
                          o_imag.reshape(B, C, H, Wf))
    y_sp = jnp.fft.irfft2(y_c, s=(H, W), norm=norm)  # (B, C, H, W)

    return _modulate_pallas(y_sp.astype(x.dtype), x)


def init_params(key, out_channel):
    """Deterministic init for the two 1x1 convs (2C -> 2C)."""
    C2 = 2 * out_channel
    k1, k2, k3, k4 = jax.random.split(key, 4)
    scale = 1.0 / jnp.sqrt(C2)
    w1 = jax.random.uniform(k1, (C2, C2), jnp.float32, -scale, scale)
    b1 = jax.random.uniform(k2, (C2,), jnp.float32, -scale, scale)
    w2 = jax.random.uniform(k3, (C2, C2), jnp.float32, -scale, scale)
    b2 = jax.random.uniform(k4, (C2,), jnp.float32, -scale, scale)
    return (w1, b1, w2, b2)


# ----------------------------------------------------------------------------
# Pure-JAX reference (sanity check)
# ----------------------------------------------------------------------------
def ffml_reference(x, params, norm="backward"):
    B, C, H, W = x.shape
    w1, b1, w2, b2 = params
    y = jnp.fft.rfft2(x, norm=norm)
    y_f = jnp.concatenate([jnp.real(y), jnp.imag(y)], axis=1)   # (B, 2C, H, Wf)
    h = jnp.einsum("oc,bchw->bohw", w1, y_f) + b1[None, :, None, None]
    h = jnp.maximum(h, 0.0)
    o = jnp.einsum("oc,bchw->bohw", w2, h) + b2[None, :, None, None]
    y_c = o[:, :C] + 1j * o[:, C:]
    y_sp = jnp.fft.irfft2(y_c, s=(H, W), norm=norm)
    return y_sp * x


if __name__ == "__main__":
    key = jax.random.PRNGKey(0)
    kx, kp = jax.random.split(key)

    B, C, H, W = 2, 4, 16, 16
    x = jax.random.normal(kx, (B, C, H, W), jnp.float32)
    params = init_params(kp, C)

    out = ffml_forward(x, params)
    out = jax.block_until_ready(out)

    ref = ffml_reference(x, params)
    assert out.shape == (B, C, H, W)
    assert jnp.allclose(out, ref, atol=1e-4, rtol=1e-4), (
        float(jnp.max(jnp.abs(out - ref))))

    print("KERNEL_OK")
</pallas_src>

<mosaic_0001>
module attributes {stable_mosaic.version = 11 : i64} {
  func.func @_mlp_kernel(%arg0: i32, %arg1: i32, %arg2: memref<1x4x144xf32, #tpu.memory_space<vmem>>, %arg3: memref<1x4x144xf32, #tpu.memory_space<vmem>>, %arg4: memref<8x4xf32, #tpu.memory_space<vmem>>, %arg5: memref<8x4xf32, #tpu.memory_space<vmem>>, %arg6: memref<8x1xf32, #tpu.memory_space<vmem>>, %arg7: memref<4x8xf32, #tpu.memory_space<vmem>>, %arg8: memref<4x8xf32, #tpu.memory_space<vmem>>, %arg9: memref<4x1xf32, #tpu.memory_space<vmem>>, %arg10: memref<4x1xf32, #tpu.memory_space<vmem>>, %arg11: memref<1x4x144xf32, #tpu.memory_space<vmem>>, %arg12: memref<1x4x144xf32, #tpu.memory_space<vmem>>) attributes {dimension_semantics = [#tpu.dimension_semantics<parallel>, #tpu.dimension_semantics<parallel>], iteration_bounds = array<i64: 2, 1>, scalar_prefetch = 0 : i64, scratch_operands = 0 : i64, tpu.core_type = #tpu.core_type<tc>, window_params = [{transform_indices = @transform_0, window_bounds = array<i64: 1, 4, 144>}, {transform_indices = @transform_1, window_bounds = array<i64: 1, 4, 144>}, {pipeline_mode = #tpu.pipeline_mode<synchronous>, transform_indices = @transform_2, window_bounds = array<i64: 8, 4>}, {pipeline_mode = #tpu.pipeline_mode<synchronous>, transform_indices = @transform_3, window_bounds = array<i64: 8, 4>}, {pipeline_mode = #tpu.pipeline_mode<synchronous>, transform_indices = @transform_4, window_bounds = array<i64: 8, 1>}, {pipeline_mode = #tpu.pipeline_mode<synchronous>, transform_indices = @transform_5, window_bounds = array<i64: 4, 8>}, {pipeline_mode = #tpu.pipeline_mode<synchronous>, transform_indices = @transform_6, window_bounds = array<i64: 4, 8>}, {pipeline_mode = #tpu.pipeline_mode<synchronous>, transform_indices = @transform_7, window_bounds = array<i64: 4, 1>}, {pipeline_mode = #tpu.pipeline_mode<synchronous>, transform_indices = @transform_8, window_bounds = array<i64: 4, 1>}, {transform_indices = @transform_9, window_bounds = array<i64: 1, 4, 144>}, {transform_indices = @transform_10, window_bounds = array<i64: 1, 4, 144>}]} {
    %c0 = arith.constant 0 : index
    %c0_0 = arith.constant 0 : index
    %c0_1 = arith.constant 0 : index
    %0 = vector.load %arg2[%c0, %c0_0, %c0_1] : memref<1x4x144xf32, #tpu.memory_space<vmem>>, vector<1x4x144xf32>
    %1 = vector.shape_cast %0 : vector<1x4x144xf32> to vector<4x144xf32>
    %c0_2 = arith.constant 0 : index
    %c0_3 = arith.constant 0 : index
    %c0_4 = arith.constant 0 : index
    %2 = vector.load %arg3[%c0_2, %c0_3, %c0_4] : memref<1x4x144xf32, #tpu.memory_space<vmem>>, vector<1x4x144xf32>
    %3 = vector.shape_cast %2 : vector<1x4x144xf32> to vector<4x144xf32>
    %c0_5 = arith.constant 0 : index
    %c0_6 = arith.constant 0 : index
    %4 = vector.load %arg4[%c0_5, %c0_6] : memref<8x4xf32, #tpu.memory_space<vmem>>, vector<8x4xf32>
    %cst = arith.constant dense<0.000000e+00> : vector<8x144xf32>
    %5 = tpu.matmul %4, %1, %cst {dimension_numbers = #tpu.dot_dimension_numbers<[1], [0], [0], [1], [0, 0, 1, 1], [], []>} : vector<8x4xf32>, vector<4x144xf32>, vector<8x144xf32> -> vector<8x144xf32>
    %c0_7 = arith.constant 0 : index
    %c0_8 = arith.constant 0 : index
    %6 = vector.load %arg5[%c0_7, %c0_8] : memref<8x4xf32, #tpu.memory_space<vmem>>, vector<8x4xf32>
    %cst_9 = arith.constant dense<0.000000e+00> : vector<8x144xf32>
    %7 = tpu.matmul %6, %3, %cst_9 {dimension_numbers = #tpu.dot_dimension_numbers<[1], [0], [0], [1], [0, 0, 1, 1], [], []>} : vector<8x4xf32>, vector<4x144xf32>, vector<8x144xf32> -> vector<8x144xf32>
    %8 = arith.addf %5, %7 : vector<8x144xf32>
    %c0_10 = arith.constant 0 : index
    %c0_11 = arith.constant 0 : index
    %9 = vector.load %arg6[%c0_10, %c0_11] : memref<8x1xf32, #tpu.memory_space<vmem>>, vector<8x1xf32>
    %10 = vector.broadcast %9 : vector<8x1xf32> to vector<8x144xf32>
    %11 = arith.addf %8, %10 : vector<8x144xf32>
    %cst_12 = arith.constant 0.000000e+00 : f32
    %12 = vector.broadcast %cst_12 : f32 to vector<8x144xf32>
    %13 = arith.maximumf %11, %12 : vector<8x144xf32>
    %c0_13 = arith.constant 0 : index
    %c0_14 = arith.constant 0 : index
    %14 = vector.load %arg7[%c0_13, %c0_14] : memref<4x8xf32, #tpu.memory_space<vmem>>, vector<4x8xf32>
    %cst_15 = arith.constant dense<0.000000e+00> : vector<4x144xf32>
    %15 = tpu.matmul %14, %13, %cst_15 {dimension_numbers = #tpu.dot_dimension_numbers<[1], [0], [0], [1], [0, 0, 1, 1], [], []>} : vector<4x8xf32>, vector<8x144xf32>, vector<4x144xf32> -> vector<4x144xf32>
    %c0_16 = arith.constant 0 : index
    %c0_17 = arith.constant 0 : index
    %16 = vector.load %arg9[%c0_16, %c0_17] : memref<4x1xf32, #tpu.memory_space<vmem>>, vector<4x1xf32>
    %17 = vector.broadcast %16 : vector<4x1xf32> to vector<4x144xf32>
    %18 = arith.addf %15, %17 : vector<4x144xf32>
    %c0_18 = arith.constant 0 : index
    %c0_19 = arith.constant 0 : index
    %19 = vector.load %arg8[%c0_18, %c0_19] : memref<4x8xf32, #tpu.memory_space<vmem>>, vector<4x8xf32>
    %cst_20 = arith.constant dense<0.000000e+00> : vector<4x144xf32>
    %20 = tpu.matmul %19, %13, %cst_20 {dimension_numbers = #tpu.dot_dimension_numbers<[1], [0], [0], [1], [0, 0, 1, 1], [], []>} : vector<4x8xf32>, vector<8x144xf32>, vector<4x144xf32> -> vector<4x144xf32>
    %c0_21 = arith.constant 0 : index
    %c0_22 = arith.constant 0 : index
    %21 = vector.load %arg10[%c0_21, %c0_22] : memref<4x1xf32, #tpu.memory_space<vmem>>, vector<4x1xf32>
    %22 = vector.broadcast %21 : vector<4x1xf32> to vector<4x144xf32>
    %23 = arith.addf %20, %22 : vector<4x144xf32>
    %c0_23 = arith.constant 0 : index
    %c0_24 = arith.constant 0 : index
    %c0_25 = arith.constant 0 : index
    %24 = vector.load %arg11[%c0_23, %c0_24, %c0_25] : memref<1x4x144xf32, #tpu.memory_space<vmem>>, vector<1x4x144xf32>
    %25 = vector.shape_cast %24 : vector<1x4x144xf32> to vector<4x144xf32>
    %26 = vector.shape_cast %18 : vector<4x144xf32> to vector<1x4x144xf32>
    tpu.vector_store %arg11[%c0_23, %c0_24, %c0_25], %26 {strides = array<i32>} : memref<1x4x144xf32, #tpu.memory_space<vmem>>, vector<1x4x144xf32>,
    %c0_26 = arith.constant 0 : index
    %c0_27 = arith.constant 0 : index
    %c0_28 = arith.constant 0 : index
    %27 = vector.load %arg12[%c0_26, %c0_27, %c0_28] : memref<1x4x144xf32, #tpu.memory_space<vmem>>, vector<1x4x144xf32>
    %28 = vector.shape_cast %27 : vector<1x4x144xf32> to vector<4x144xf32>
    %29 = vector.shape_cast %23 : vector<4x144xf32> to vector<1x4x144xf32>
    tpu.vector_store %arg12[%c0_26, %c0_27, %c0_28], %29 {strides = array<i32>} : memref<1x4x144xf32, #tpu.memory_space<vmem>>, vector<1x4x144xf32>,
    return
  }
  func.func @transform_0(%arg0: i32, %arg1: i32) -> (i32, i32, i32) {
    %c0_i32 = arith.constant 0 : i32
    %c0_i32_0 = arith.constant 0 : i32
    return %arg0, %c0_i32, %arg1 : i32, i32, i32
  }
  func.func @transform_1(%arg0: i32, %arg1: i32) -> (i32, i32, i32) {
    %c0_i32 = arith.constant 0 : i32
    %c0_i32_0 = arith.constant 0 : i32
    return %arg0, %c0_i32, %arg1 : i32, i32, i32
  }
  func.func @transform_2(%arg0: i32, %arg1: i32) -> (i32, i32) {
    %c0_i32 = arith.constant 0 : i32
    %c0_i32_0 = arith.constant 0 : i32
    %c0_i32_1 = arith.constant 0 : i32
    return %c0_i32, %c0_i32_0 : i32, i32
  }
  func.func @transform_3(%arg0: i32, %arg1: i32) -> (i32, i32) {
    %c0_i32 = arith.constant 0 : i32
    %c0_i32_0 = arith.constant 0 : i32
    %c0_i32_1 = arith.constant 0 : i32
    return %c0_i32, %c0_i32_0 : i32, i32
  }
  func.func @transform_4(%arg0: i32, %arg1: i32) -> (i32, i32) {
    %c0_i32 = arith.constant 0 : i32
    %c0_i32_0 = arith.constant 0 : i32
    %c0_i32_1 = arith.constant 0 : i32
    return %c0_i32, %c0_i32_0 : i32, i32
  }
  func.func @transform_5(%arg0: i32, %arg1: i32) -> (i32, i32) {
    %c0_i32 = arith.constant 0 : i32
    %c0_i32_0 = arith.constant 0 : i32
    %c0_i32_1 = arith.constant 0 : i32
    return %c0_i32, %c0_i32_0 : i32, i32
  }
  func.func @transform_6(%arg0: i32, %arg1: i32) -> (i32, i32) {
    %c0_i32 = arith.constant 0 : i32
    %c0_i32_0 = arith.constant 0 : i32
    %c0_i32_1 = arith.constant 0 : i32
    return %c0_i32, %c0_i32_0 : i32, i32
  }
  func.func @transform_7(%arg0: i32, %arg1: i32) -> (i32, i32) {
    %c0_i32 = arith.constant 0 : i32
    %c0_i32_0 = arith.constant 0 : i32
    %c0_i32_1 = arith.constant 0 : i32
    return %c0_i32, %c0_i32_0 : i32, i32
  }
  func.func @transform_8(%arg0: i32, %arg1: i32) -> (i32, i32) {
    %c0_i32 = arith.constant 0 : i32
    %c0_i32_0 = arith.constant 0 : i32
    %c0_i32_1 = arith.constant 0 : i32
    return %c0_i32, %c0_i32_0 : i32, i32
  }
  func.func @transform_9(%arg0: i32, %arg1: i32) -> (i32, i32, i32) {
    %c0_i32 = arith.constant 0 : i32
    %c0_i32_0 = arith.constant 0 : i32
    return %arg0, %c0_i32, %arg1 : i32, i32, i32
  }
  func.func @transform_10(%arg0: i32, %arg1: i32) -> (i32, i32, i32) {
    %c0_i32 = arith.constant 0 : i32
    %c0_i32_0 = arith.constant 0 : i32
    return %arg0, %c0_i32, %arg1 : i32, i32, i32
  }
}

</mosaic_0001>

<bundles_post_ra>
// kernel: tpu_custom_call.1
= control target key start
LH: loop header
LB: loop body
LE: loop exit
PB: predicated region body
PF: predicated region fallthrough
CT: control target
= control target key end

     0   :  { %s1393_s0 = inlined_call_operand.vmem [shape: f32[2,4,144], index: 0, kind: input, shape index: {}]   ;;  %s1394_s1 = inlined_call_operand.vmem [shape: f32[2,4,144], index: 1, kind: input, shape index: {}]   ;;  %s1395_s2 = inlined_call_operand.vmem [shape: f32[8,4], index: 2, kind: input, shape index: {}]   ;;  %s1396_s3 = inlined_call_operand.vmem [shape: f32[8,4], index: 3, kind: input, shape index: {}]   ;;  %s1397_s4 = inlined_call_operand.vmem [shape: f32[8,1], index: 4, kind: input, shape index: {}]   ;;  %s1398_s5 = inlined_call_operand.vmem [shape: f32[4,8], index: 5, kind: input, shape index: {}]   ;;  %s1399_s6 = inlined_call_operand.vmem [shape: f32[4,8], index: 6, kind: input, shape index: {}]   ;;  %s1400_s7 = inlined_call_operand.vmem [shape: f32[4,1], index: 7, kind: input, shape index: {}]   ;;  %s1401_s8 = inlined_call_operand.vmem [shape: f32[4,1], index: 8, kind: input, shape index: {}]   ;;  %s1402_s9 = inlined_call_operand.hbm [shape: f32[2,4,144], index: 9, kind: output, shape index: {0}]   ;;  %s1403_s10 = inlined_call_operand.hbm [shape: f32[2,4,144], index: 10, kind: output, shape index: {1}]  }
   0x1   :  { %1406 = sst [smem:[#allocation10_spill]] %s1393_s0 }
   0x2   :  { %1407 = sst [smem:[#allocation11_spill]] %s1394_s1 }
   0x3   :  { %16 = vsyncpa [#allocation3], 0 }
   0x4   :  { %18 = vsyncpa [#allocation3 + $0x1], 0 }
   0x5   :  { %19 = vsyncpa [#allocation5], 0 }
   0x6   :  { %21 = vsyncpa [#allocation5 + $0x1], 0  ;;  %s1221_s13 = smov 0   ;;  %s1223_s14 = smov 0  }
   0x7   :  { %s1225_s15 = smov 0   ;;  %s1227_s16 = smov 0  }
   0x8   :  { %s1229_s17 = smov 0   ;;  %s1231_s18 = smov 0  }
   0x9 LB: > { %1408 = sst [smem:[#allocation8_spill]] %s1156_s17  ;;  %s957_s19 = sadd.s32 4294967295, %s1160_s18   ;;  %s1160_s18 = sphi %s1231_s18, %s27_s18   ;;  %s1156_s17 = sphi %s1229_s17, %s1415_s17   ;;  %s1152_s16 = sphi %s1227_s16, %s1414_s16   ;;  %s1148_s15 = sphi %s1225_s15, %s1418_s15   ;;  %s1144_s14 = sphi %s1223_s14, %s1417_s14   ;;  %s1140_s13 = sphi %s1221_s13, %s1416_s13  }
   0xa   : > { %s958_s20 = sadd.s32 4294967294, %s1160_s18   ;;  %s39_s21 = sadd.s32 1, %s1156_s17 }
   0xb   : > { %s251_s22 = sadd.s32 1, %s1148_s15  ;;  %p41_p0 = scmp.ge.s32.totalorder %s39_s21, 2 }
   0xc   : > { %p261_p1 = scmp.ne.s32.totalorder %s1148_s15, %s1144_s14  ;;  %p262_p2 = scmp.eq.s32.totalorder %s957_s19, 1 }
   0xd   : > { %p267_p3 = scmp.ne.s32.totalorder %s1144_s14, %s1140_s13  ;;  %s1420_s21 = smov (%p41_p0, %s39_s21), 0 }
   0xe   : > { %1409 = sst [smem:[#allocation9_spill]] %s1420_s21  ;;  %p1261_p4 = por %p262_p2, %p261_p1 }
   0xf   : > { %p268_p5 = scmp.eq.s32.totalorder %s958_s20, 1  ;;  %s246_s24 = ssub.s32 %s1156_s17, %s1420_s21 }
  0x10   : > { %p961_p6 = scmp.ge.s32.totalorder %s1160_s18, 1  ;;  %p249_p7 = scmp.eq.s32.totalorder %s246_s24, 0 }
  0x11   : > { %p1268_p8 = por %p268_p5, %p267_p3  ;;  %p361_p9 = scmp.lt.s32.totalorder %s1160_s18, 3 }
  0x12   : > { %s1274_s26 = scalar_select %p249_p7, %s1148_s15, %s251_s22  }
  0x13   : > { %p362_p10 = pnand %p961_p6, %p361_p9 }
  0x14   : > { %p418_p11 = scmp.lt.s32.totalorder (!%p362_p10), %s1152_s16, 1  ;;  %s1412_s1 = sld [smem:[#allocation11_spill]] (!%p362_p10) }
  0x15   : > { %365 = sbr.rel (%p362_p10) target bundleno = 473 (0x1d9), region = 56  ;;  %s1413_s0 = sld [smem:[#allocation10_spill]] (!%p362_p10) }
  0x16   : > { %s986_s27 = sshll.u32 (!%p362_p10), %s1152_s16, 7 }
  0x17   : > { %s1318_s12 = scalar_lea.hbm (!%p362_p10), %s1402_s9, %s986_s27  ;;  %s1325_s20 = scalar_lea.hbm (!%p362_p10), %s1403_s10, %s986_s27 }
  0x1a   : > { %v1162_v0 = vmov 0.0   ;;  %v605_v1 = vld [vmem:[%s1397_s4] sm:$0xff]  ;;  %s419_s29 = scalar_select %p418_p11, %s1152_s16, 1  ;;  %v1163_v2 = vmov 0   ;;  %vm449_vm0 = vcmask 1043456   ;;  %vm445_vm1 = vcmask 31744  }
  0x1b   : > { %518 = vmatprep.mubr.f32.mxu0 %v1162_v0  ;;  %598 = vmatprep.mubr.f32.mxu1 %v1162_v0  ;;  %v616_v3 = vld [vmem:[%s1400_s7] sm:$0xf]  ;;  %vm622_vm2 = vcmask 64512   ;;  %vm782_vm3 = vcmask 130052  }
  0x1c   : > { %1050 = vset.pattern.permute.xlu0 %v1163_v2  ;;  %1051 = vset.pattern.permute.xlu1 %v1163_v2  ;;  %s984_s30 = sshll.u32 %s419_s29, 3  ;;  %v442_v8 = vld [vmem:[%s1396_s3] sm:$0xff]  ;;  %vm783_vm4 = vmor %vm782_vm3, %vm449_vm0 }
  0x1d   : > { %608 = vperm.xlu0 %1050, %v605_v1   ;;  %s435_s22 = scalar_lea.vmem %s1412_s1, %s984_s30  ;;  %s425_s17 = scalar_lea.vmem %s1413_s0, %s984_s30  ;;  %v441_v9 = vld [vmem:[%s1395_s2] sm:$0xff] }
  0x1e   : > { %v440_v4 = vld [vmem:[%s435_s22] sm:$0xff]  ;;  %s1310_s22 = sand.u32 1, %s1144_s14   ;;  %s1164_s30 = smov [#allocation2]  }
  0x1f   : > { %v439_v5 = vld [vmem:[%s425_s17] sm:$0xff]  ;;  %v444_v6 = vcombine.high %v440_v4, %v440_v4  ;;  %s962_s24 = sshll.u32 %s1310_s22, 3  ;;  %s1058_s0 = sshll.u32 %s1164_s30, 4  ;;  %s1059_s0 = int_to_ptr.vmem [resolvable:$false] %s1058_s0 }
  0x20   : > { %v526_v7 = vcombine.high %v439_v5, %v439_v5  ;;  %v698_v10 = vld [vmem:[%s1401_s8] sm:$0xf]  ;;  %s409_s28 = scalar_lea.vmem [#allocation2], %s962_s24  ;;  %s416_s11 = scalar_lea.vmem [#allocation4], %s962_s24 }
  0x21   : > { %619 = vperm.xlu0 %1050, %v616_v3   ;;  %968 = vmatprep.subr.msk.mxu0 %vm449_vm0, %v444_v6  ;;  %v615_v22 = vld [vmem:[%s1398_s5] sm:$0xf]  ;;  %s812_s29 = sshll.u32 %s409_s28, 4  ;;  %s828_s17 = sshll.u32 %s416_s11, 4  ;;  %s1320_s29 = int_to_ptr.vmem [resolvable:$true] %s812_s29  ;;  %s1327_s17 = int_to_ptr.vmem [resolvable:$true] %s828_s17 }
  0x22   : > { %971 = vmatprep.subr.msk.mxu1 %vm449_vm0, %v526_v7  ;;  %969 = vmatpush1.msk.msra.mxu0 %vm449_vm0, %v440_v4  ;;  %v697_v23 = vld [vmem:[%s1399_s6] sm:$0xf]  ;;  %s791_s24 = scalar_lea.sflag [#allocation3], %s1310_s22  ;;  %s1054_s21 = scalar_lea.vmem %s1320_s29, 128 }
  0x23   : > { %972 = vmatpush1.msk.msra.mxu1 %vm449_vm0, %v439_v5  ;;  %970 = vmatmul.mubr.msk.f32.vlgmr.msra.gmra.mxu0 %vm445_vm1, %v442_v8  ;;  %p1055_p12 = scmp.ne.s32.totalorder %s1320_s29, %s1054_s21  ;;  %s1060_s1 = scalar_lea.vmem %s1059_s0, 256 }
  0x24   : > { %973 = vmatmul.mubr.msk.f32.vlgmr.msra.gmra.mxu1 %vm445_vm1, %v441_v9  ;;  %690 = vmatprep.mubr.f32.mxu0 %v1162_v0  ;;  %p1061_p1 = scmp.lt.s32.totalorder %s1320_s29, %s1059_s0  ;;  %p1062_p2 = scmp.lt.s32.totalorder %s1060_s1, %s1054_s21 }
  0x25   : > { %771 = vmatprep.mubr.f32.mxu1 %v1162_v0  ;;  %701 = vperm.xlu1 %1051, %v698_v10   ;;  %p1056_p13 = pnand %p1055_p12, %p1261_p4 }
  0x26   : > { %p1063_p3 = por %p1062_p2, %p1061_p1 }
  0x27   : > { %p1057_p0 = pneg %p1056_p13 }
  0x29   : > { %p1064_p5 = pnand %p1063_p3, %p1057_p0 }
  0x98   : > { %v609_v16 = vpop.permute.xlu0 %608 }
  0x9c   : > { %v620_v27 = vpop.permute.xlu0 %619 }
  0xa0   : > { %v702_v24 = vpop.permute.xlu1 %701 }
  0xe3   : > { %v520_v11 = vpop.f32.mrf.mxu0 }
  0xe4   : > { %v600_v12 = vpop.f32.mrf.mxu1 }
  0xe5   : > { %v601_v13 = vadd.f32 %v600_v12, %v520_v11  ;;  %v522_v14 = vpop.f32.mrf.mxu0 }
  0xe6   : > { %v602_v15 = vpop.f32.mrf.mxu1 }
  0xe7   : > { %v603_v17 = vadd.f32 %v602_v15, %v522_v14  ;;  %v611_v18 = vadd.f32 %v609_v16, %v601_v13 }
  0xe9   : > { %v612_v19 = vadd.f32 %v609_v16, %v603_v17  ;;  %v613_v21 = vmax.f32 %v611_v18, 0.0 }
  0xeb   : > { %v614_v20 = vmax.f32 %v612_v19, 0.0 }
  0xed   : > { %656 = vmatprep.subr.mxu0 %v614_v20  ;;  %737 = vmatprep.subr.mxu1 %v614_v20 }
  0xee   : > { %657 = vmatpush1.msra.mxu0 %v613_v21  ;;  %738 = vmatpush1.msra.mxu1 %v613_v21 }
  0xef   : > { %974 = vmatmul.mubr.msk.f32.vlgmr.msra.gmra.mxu0 %vm622_vm2, %v615_v22  ;;  %975 = vmatmul.mubr.msk.f32.vlgmr.msra.gmra.mxu1 %vm622_vm2, %v697_v23 }
 0x1af   : > { %v692_v25 = vpop.f32.mrf.mxu0  ;;  %v773_v26 = vpop.f32.mrf.mxu1 }
 0x1b0   : > { %v693_v30 = vadd.f32 %v692_v25, %v620_v27  ;;  %v774_v32 = vadd.f32 %v773_v26, %v702_v24 }
 0x1b1   : > { %v694_v28 = vpop.f32.mrf.mxu0  ;;  %v775_v29 = vpop.f32.mrf.mxu1 }
 0x1b2   : > { %v695_v31 = vadd.f32 %v694_v28, %v620_v27  ;;  %v776_v33 = vadd.f32 %v775_v29, %v702_v24 }
 0x1b4   : > { %v780_v34 = vcombine.low %v693_v30, %v695_v31  ;;  %v787_v35 = vcombine.low %v774_v32, %v776_v33 }
 0x1b6   : > { %784 = vst.msk [vmem:[%s409_s28] sm:$0xff] %vm783_vm4, %v780_v34  ;;  %789 = vst.msk [vmem:[%s416_s11] sm:$0xff] %vm783_vm4, %v787_v35 }
 0x1b7   : > { %1067 = shalt.err (!%p1064_p5)
}
 0x1b8   : > { %s1068_s27 = scalar_lea.hbm %s1318_s12, 128  ;;  %s1072_s16 = scalar_lea.hbm %s1402_s9, 256 }
 0x1b9   : > { %p1069_p6 = scmp.ne.s32.totalorder %s1318_s12, %s1068_s27  ;;  %p1073_p10 = scmp.lt.s32.totalorder %s1318_s12, %s1402_s9 }
 0x1ba   : > { %p1074_p11 = scmp.lt.s32.totalorder %s1072_s16, %s1068_s27 }
 0x1bb   : > { %p1070_p7 = pnand %p1069_p6, %p1261_p4 }
 0x1bc   : > { %p1075_p12 = por %p1074_p11, %p1073_p10 }
 0x1bd   : > { %p1071_p9 = pneg %p1070_p7 }
 0x1bf   : > { %p1076_p13 = pnand %p1075_p12, %p1071_p9 }
 0x1c1   : > { %1079 = shalt.err (!%p1076_p13)
}
 0x1c2   : > { %988 = dma.vmem_to_hbm [thread:$0]  (%p1261_p4), %s1320_s29, 128, %s1318_s12, %s791_s24  }
 0x1c3   : > { %s796_s0 = scalar_lea.sflag [#allocation5], %s1310_s22  ;;  %s1080_s1 = scalar_lea.vmem %s1327_s17, 128 }
 0x1c4   : > { %p1081_p0 = scmp.ne.s32.totalorder %s1327_s17, %s1080_s1  ;;  %s1165_s21 = smov [#allocation4]  }
 0x1c5   : > { %s1084_s27 = sshll.u32 %s1165_s21, 4  ;;  %s1085_s27 = int_to_ptr.vmem [resolvable:$false] %s1084_s27 }
 0x1c6   : > { %p1082_p1 = pnand %p1081_p0, %p1261_p4  ;;  %s1086_s28 = scalar_lea.vmem %s1085_s27, 256 }
 0x1c7   : > { %p1087_p3 = scmp.lt.s32.totalorder %s1327_s17, %s1085_s27  ;;  %p1088_p5 = scmp.lt.s32.totalorder %s1086_s28, %s1080_s1 }
 0x1c8   : > { %p1083_p2 = pneg %p1082_p1 }
 0x1c9   : > { %p1089_p6 = por %p1088_p5, %p1087_p3 }
 0x1cb   : > { %p1090_p7 = pnand %p1089_p6, %p1083_p2 }
 0x1cd   : > { %1093 = shalt.err (!%p1090_p7)
}
 0x1ce   : > { %s1094_s29 = scalar_lea.hbm %s1325_s20, 128  ;;  %s1098_s24 = scalar_lea.hbm %s1403_s10, 256 }
 0x1cf   : > { %p1095_p9 = scmp.ne.s32.totalorder %s1325_s20, %s1094_s29  ;;  %p1099_p12 = scmp.lt.s32.totalorder %s1325_s20, %s1403_s10 }
 0x1d0   : > { %p1100_p13 = scmp.lt.s32.totalorder %s1098_s24, %s1094_s29 }
 0x1d1   : > { %p1096_p10 = pnand %p1095_p9, %p1261_p4 }
 0x1d2   : > { %p1101_p0 = por %p1100_p13, %p1099_p12 }
 0x1d3   : > { %p1097_p11 = pneg %p1096_p10 }
 0x1d5   : > { %p1102_p1 = pnand %p1101_p0, %p1097_p11 }
 0x1d7   : > { %1105 = shalt.err (!%p1102_p1)
}
 0x1d8   : > { %989 = dma.vmem_to_hbm [thread:$0]  (%p1261_p4), %s1327_s17, 128, %s1325_s20, %s796_s0  }
 0x1d9 PF: > { %p999_p2 = scmp.ge.s32.totalorder %s1160_s18, 2  ;;  %s840_s19 = sand.u32 1, %s1140_s13  }
 0x1da   : > { %s841_s30 = scalar_lea.sflag [#allocation3], %s840_s19 }
 0x1db   : > { %p993_p3 = pnand %p999_p2, %p1268_p8 }
 0x1dd   : > { %p994_p5 = pneg %p993_p3 }
 0x1df   : > { %1131 = dma.done.wait (%p994_p5), %s841_s30, 128  }
 0x1e0   : > { %1133 = vsyncadd (%p994_p5), %s841_s30, 4294967168  ;;  %s850_s1 = scalar_lea.sflag [#allocation5], %s840_s19 }
 0x1e1   : > { %1135 = dma.done.wait (%p994_p5), %s850_s1, 128  }
 0x1e2   : > { %1137 = vsyncadd (%p994_p5), %s850_s1, 4294967168  ;;  %s27_s18 = sadd.s32 1, %s1160_s18   ;;  %s1414_s16 = sld [smem:[#allocation8_spill]] }
 0x1e3   : > { %p24_p6 = scmp.ge.s32.totalorder %s27_s18, 4   ;;  %s1415_s17 = sld [smem:[#allocation9_spill]] }
 0x1e4   : > { %s1416_s13 = smov %s1144_s14  ;;  %s1417_s14 = smov %s1148_s15 }
 0x1e5   : > { %s1418_s15 = smov %s1274_s26  ;;  %26 = sbr.rel (!%p24_p6) target bundleno = 9 (0x9), region = 111 }
 0x1ea   :  { %855 = vsyncpa [#allocation3], 1 }
 0x1eb   :  { %857 = vsyncpa [#allocation3 + $0x1], 1 }
 0x1ec   :  { %858 = vsyncpa [#allocation5], 1 }
 0x1ed   :  { %860 = vsyncpa [#allocation5 + $0x1], 1 }

</bundles_post_ra>
